<compile_context>
chip_gen: v5e
topology: v5e:2x2
jax: 0.10.0
libtpu: 0.0.40
codegen_flags: <defaults>
</compile_context>

<pallas_src>
import jax
import jax.numpy as jnp
from jax.experimental import pallas as pl
from jax.experimental.pallas import tpu as pltpu

_COLS = 1024                           # 8 sublanes x 128 lanes: lane-dense unit
_TARGET_BLOCK_BYTES = 8 * 1024 * 1024  # ~8 MiB/block: 4x (in+out, dbl-buffered)
                                       # = 32 MiB, fits v7x (64 MiB) with room
_MIN_GRID_STEPS = 4                    # let v7x's two TensorCores both stream
_SUBLANE_PACK = {1: 32, 2: 16, 4: 8, 8: 8}   # rows per packed tile by itemsize


def _simlog_kernel(x_ref, o_ref):
    x = x_ref[...]
    # sign(x) * log(|x| + 1).  log1p (EUP) is more accurate near zero; the
    # compare+select reproduces torch.sign semantics (sign(0) -> 0) with plain
    # VPU ops.  Both units have huge slack vs. the HBM roofline.
    mag = jnp.log1p(jnp.abs(x))
    o_ref[...] = jnp.where(x < 0, -mag, mag)


def _simlog_jnp(x):
    # Same formula for the sub-1024-element ragged tail.
    mag = jnp.log1p(jnp.abs(x))
    return jnp.where(x < 0, -mag, mag)


def _simlog_impl(x: jax.Array) -> jax.Array:
    orig_shape = x.shape
    dtype = x.dtype
    n = x.size
    if n == 0:
        return x

    flat = x.reshape(-1)
    n_main = (n // _COLS) * _COLS      # kernel handles this contiguous prefix
    tail = n - n_main                  # < 1024 leftover elements, handled in jnp

    parts = []
    if n_main:
        elem_bytes = jnp.dtype(dtype).itemsize
        sub = _SUBLANE_PACK.get(elem_bytes, 8)
        rows = n_main // _COLS

        if rows <= sub:
            # Full row extent -> always a legal block shape.
            tile_rows = rows
        else:
            rows_per_block = max(
                sub,
                (_TARGET_BLOCK_BYTES // (_COLS * elem_bytes)) // sub * sub,
            )
            tile_rows = min(rows, rows_per_block)
            # Prefer >= _MIN_GRID_STEPS parallel steps so both TensorCores on a
            # v7x chip get work; only shrink if the input is big enough.
            if (pl.cdiv(rows, tile_rows) < _MIN_GRID_STEPS
                    and rows >= _MIN_GRID_STEPS * sub):
                tile_rows = max(
                    sub, (pl.cdiv(rows, _MIN_GRID_STEPS) // sub) * sub
                )

        block_bytes = tile_rows * _COLS * elem_bytes
        # 2 arrays (in + out) x 2 pipeline buffers, + 25% headroom.
        vmem_limit = max(int(4 * block_bytes * 1.25), 4 * 1024 * 1024)

        x2d = flat[:n_main].reshape(rows, _COLS)
        out2d = pl.pallas_call(
            _simlog_kernel,
            out_shape=jax.ShapeDtypeStruct((rows, _COLS), dtype),
            grid=(pl.cdiv(rows, tile_rows),),
            in_specs=[pl.BlockSpec((tile_rows, _COLS), lambda i: (i, 0))],
            out_specs=pl.BlockSpec((tile_rows, _COLS), lambda i: (i, 0)),
            compiler_params=pltpu.CompilerParams(
                dimension_semantics=("parallel",),
                vmem_limit_bytes=vmem_limit,
            ),
            cost_estimate=pl.CostEstimate(
                flops=3 * n_main,
                transcendentals=n_main,
                bytes_accessed=2 * n_main * elem_bytes,
            ),
        )(x2d)
        parts.append(out2d.reshape(-1))

    if tail:
        parts.append(_simlog_jnp(flat[n_main:]))

    out_flat = parts[0] if len(parts) == 1 else jnp.concatenate(parts)
    return out_flat.reshape(orig_shape)


# Jitted entry point: reshapes become free bitcasts, dispatch overhead is gone,
# and the prefix/tail stitching fuses into a single output write.
simlog = jax.jit(_simlog_impl)


def simlog_ref(x: jax.Array) -> jax.Array:
    # Literal translation of the PyTorch spec.
    return jnp.sign(x) * jnp.log(jnp.abs(x) + 1.0)


if __name__ == "__main__":
    key = jax.random.PRNGKey(0)
    k1, k2, k3, k4 = jax.random.split(key, 4)

    # Typical NCHW activation (element count is a multiple of 1024 -> pure
    # kernel path).
    x = jax.random.normal(k1, (2, 4, 16, 16), dtype=jnp.float32) * 3.0
    y = jax.block_until_ready(simlog(x))
    assert y.shape == x.shape and y.dtype == x.dtype
    assert jnp.allclose(y, simlog_ref(x), atol=1e-6, rtol=1e-5), "mismatch vs reference"

    # Ragged size: kernel prefix (1024 elements) + jnp tail, no pad/slice passes.
    x2 = jax.random.normal(k2, (5, 300), dtype=jnp.float32) * 2.0
    y2 = jax.block_until_ready(simlog(x2))
    assert jnp.allclose(y2, simlog_ref(x2), atol=1e-6, rtol=1e-5), "ragged mismatch"

    # Tiny ragged size (< 1024 elements -> tail-only path).
    x3 = jax.random.normal(k3, (3, 5, 7), dtype=jnp.float32)
    y3 = jax.block_until_ready(simlog(x3))
    assert jnp.allclose(y3, simlog_ref(x3), atol=1e-6, rtol=1e-5), "tiny mismatch"

    # bf16 exercises dtype-aware sublane alignment; loose tolerance for bf16 math.
    x4 = (jax.random.normal(k4, (4, 16, 32), dtype=jnp.float32) * 3.0).astype(jnp.bfloat16)
    y4 = jax.block_until_ready(simlog(x4))
    ref4 = simlog_ref(x4.astype(jnp.float32))
    assert y4.dtype == jnp.bfloat16
    assert jnp.allclose(y4.astype(jnp.float32), ref4, atol=5e-2, rtol=5e-2), "bf16 mismatch"

    print("KERNEL_OK")
</pallas_src>

<mosaic_0001>
module attributes {stable_mosaic.version = 11 : i64} {
  func.func @_simlog_kernel(%arg0: i32, %arg1: memref<2x1024xf32, #tpu.memory_space<vmem>>, %arg2: memref<2x1024xf32, #tpu.memory_space<vmem>>) attributes {dimension_semantics = [#tpu.dimension_semantics<parallel>], iteration_bounds = array<i64: 1>, scalar_prefetch = 0 : i64, scratch_operands = 0 : i64, tpu.core_type = #tpu.core_type<tc>, window_params = [{transform_indices = @transform_0, window_bounds = array<i64: 2, 1024>}, {transform_indices = @transform_1, window_bounds = array<i64: 2, 1024>}]} {
    %c0 = arith.constant 0 : index
    %c0_0 = arith.constant 0 : index
    %0 = vector.load %arg1[%c0, %c0_0] : memref<2x1024xf32, #tpu.memory_space<vmem>>, vector<2x1024xf32>
    %1 = math.absf %0 : vector<2x1024xf32>
    %2 = math.log1p %1 : vector<2x1024xf32>
    %cst = arith.constant 0.000000e+00 : f32
    %3 = vector.broadcast %cst : f32 to vector<2x1024xf32>
    %4 = arith.cmpf olt, %0, %3 : vector<2x1024xf32>
    %cst_1 = arith.constant 0.000000e+00 : f32
    %5 = vector.broadcast %cst_1 : f32 to vector<2x1024xf32>
    %6 = arith.subf %5, %2 : vector<2x1024xf32>
    %7 = arith.select %4, %6, %2 : vector<2x1024xi1>, vector<2x1024xf32>
    %c0_2 = arith.constant 0 : index
    %c0_3 = arith.constant 0 : index
    %8 = vector.load %arg2[%c0_2, %c0_3] : memref<2x1024xf32, #tpu.memory_space<vmem>>, vector<2x1024xf32>
    tpu.vector_store %arg2[%c0_2, %c0_3], %7 {strides = array<i32>} : memref<2x1024xf32, #tpu.memory_space<vmem>>, vector<2x1024xf32>,
    return
  }
  func.func @transform_0(%arg0: i32) -> (i32, i32) {
    %c0_i32 = arith.constant 0 : i32
    %c0_i32_0 = arith.constant 0 : i32
    return %arg0, %c0_i32 : i32, i32
  }
  func.func @transform_1(%arg0: i32) -> (i32, i32) {
    %c0_i32 = arith.constant 0 : i32
    %c0_i32_0 = arith.constant 0 : i32
    return %arg0, %c0_i32 : i32, i32
  }
}

</mosaic_0001>

<bundles_post_ra>
// kernel: _simlog_impl.1
= control target key start
LH: loop header
LB: loop body
LE: loop exit
PB: predicated region body
PF: predicated region fallthrough
CT: control target
= control target key end

     0   :  { %s68_s0 = inlined_call_operand.vmem [shape: f32[2,1024], index: 0, kind: input, shape index: {}]   ;;  %s69_s1 = inlined_call_operand.vmem [shape: f32[2,1024], index: 1, kind: output, shape index: {}]  }
   0x1   :  { %v8_v0 = vld [vmem:[%s68_s0] sm:$0xff]  ;;  %v9_v1 = vld [vmem:[%s68_s0 + $0x8] sm:$0xff] }
   0x2   :  { %v10_v2 = vand.u32 2147483647, %v8_v0  ;;  %v11_v3 = vand.u32 2147483647, %v9_v1  ;;  %vm30_vm2 = vcmp.lt.f32.partialorder %v8_v0, 0.0  ;;  %vm31_vm3 = vcmp.lt.f32.partialorder %v9_v1, 0.0 }
   0x4   :  { %v12_v4 = vadd.f32 1.0, %v10_v2  ;;  %v15_v5 = vmul.f32 -0.5, %v10_v2  ;;  %v21_v6 = vadd.f32 1.0, %v11_v3  ;;  %v24_v7 = vmul.f32 -0.5, %v11_v3 }
   0x5   :  { %vm19_vm0 = vcmp.lt.f32.partialorder %v10_v2, 0.0004427343  ;;  %vm28_vm1 = vcmp.lt.f32.partialorder %v11_v3, 0.0004427343 }
   0x6   :  { %42 = vlog2.f32 %v12_v4  ;;  %v16_v8 = vadd.f32 1.0, %v15_v5  ;;  %v25_v9 = vadd.f32 1.0, %v24_v7 }
   0x7   :  { %44 = vlog2.f32 %v21_v6 }
   0x8   :  { %v17_v10 = vmul.f32 %v16_v8, %v10_v2  ;;  %v26_v12 = vmul.f32 %v25_v9, %v11_v3 }
   0xc   :  { %v43_v11 = vpop.eup %42 }
   0xd   :  { %v45_v13 = vpop.eup %44  ;;  %v14_v14 = vmul.f32 0.6931472, %v43_v11 }
   0xe   :  { %v23_v15 = vmul.f32 0.6931472, %v45_v13 }
   0xf   :  { %v20_v16 = vsel %vm19_vm0, %v17_v10, %v14_v14 }
  0x10   :  { %v32_v17 = vsub.f32 0.0, %v20_v16  ;;  %v29_v18 = vsel %vm28_vm1, %v26_v12, %v23_v15 }
  0x11   :  { %v33_v19 = vsub.f32 0.0, %v29_v18 }
  0x12   :  { %v34_v20 = vsel %vm30_vm2, %v32_v17, %v20_v16 }
  0x13   :  { %36 = vst [vmem:[%s69_s1] sm:$0xff] %v34_v20  ;;  %v35_v21 = vsel %vm31_vm3, %v33_v19, %v29_v18 }
  0x14   :  { %37 = vst [vmem:[%s69_s1 + $0x8] sm:$0xff] %v35_v21 }

</bundles_post_ra>
